<compile_context>
chip_gen: v7x
topology: tpu7x:2x2x1
jax: 0.10.0
libtpu: 0.0.40
codegen_flags: <defaults>
</compile_context>

<pallas_src>
import functools

import jax
import jax.numpy as jnp
from jax.experimental import pallas as pl
from jax.experimental.pallas import tpu as pltpu


def _gumbel_distractor_kernel(w_ref, b_ref, x_ref, o_ref, *, n_layers, H, W, LP):
    # w_ref: SMEM (n_layers*9,) flattened 3x3 conv weights (row-major ki, kj)
    # b_ref: SMEM (n_layers,)   conv biases
    # x_ref: VMEM (TG, H, LP*W) TG lane-packed groups of LP images each
    # o_ref: VMEM (TG, H, LP*W)
    LPW = LP * W
    x = x_ref[...].astype(jnp.float32)            # (TG, H, LPW)
    TG = x.shape[0]
    shape = (TG, H, LPW)

    # ---- boundary masks, hoisted once (reused by every conv layer) ----
    row_ids = jax.lax.broadcasted_iota(jnp.int32, shape, 1)
    col_ids = jax.lax.broadcasted_iota(jnp.int32, shape, 2) & (W - 1)  # column inside image
    keep_row = {-1: row_ids > 0,          # tap reads x[i-1, :]
                +1: row_ids < (H - 1)}    # tap reads x[i+1, :]
    keep_col = {-1: col_ids > 0,          # tap reads x[:, j-1]
                +1: col_ids < (W - 1)}    # tap reads x[:, j+1]

    # ---- n_layers x (3x3 conv, stride 1, zero padding 1, 1 -> 1 channel) ----
    for layer in range(n_layers):
        # Row-shifted variants via sublane rolls; wrapped rows masked to zero.
        rows = {0: x}
        for di in (-1, 1):
            shifted = pltpu.roll(x, shift=(-di) % H, axis=1)   # y[i] = x[i + di]
            rows[di] = jnp.where(keep_row[di], shifted, 0.0)
        acc = jnp.full(shape, b_ref[layer], jnp.float32)
        for di in (-1, 0, 1):
            xr = rows[di]
            for dj in (-1, 0, 1):
                if dj == 0:
                    term = xr
                else:
                    # Lane roll moves columns within each packed image; the lane
                    # that crosses an image boundary is exactly the zero-padding
                    # halo, so mask it to zero.
                    term = pltpu.roll(xr, shift=(-dj) % LPW, axis=2)
                    term = jnp.where(keep_col[dj], term, 0.0)
                w = w_ref[layer * 9 + (di + 1) * 3 + (dj + 1)]
                acc = acc + w * term
        x = acc

    # ---- softmax over dim=-1 (W): segmented all-reduce over each image's lanes ----
    def seg_allreduce(v, combine):
        s = 1
        while s < W:
            lo = pltpu.roll(v, shift=s, axis=2)               # v[l - s]
            hi = pltpu.roll(v, shift=(s - W) % LPW, axis=2)   # v[l - s + W]
            partner = jnp.where(col_ids >= s, lo, hi)         # cyclic within segment
            v = combine(v, partner)
            s *= 2
        return v

    m_w = seg_allreduce(x, jnp.maximum)           # per-(image,row) max, broadcast to lanes
    e_w = jnp.exp(x - m_w)
    s_w = seg_allreduce(e_w, jnp.add)             # per-(image,row) sum, broadcast to lanes

    # ---- softmax over dim=-2 (H): plain sublane reduction per lane ----
    m_h = jnp.max(x, axis=1, keepdims=True)
    e_h = jnp.exp(x - m_h)
    s_h = jnp.sum(e_h, axis=1, keepdims=True)

    # x_soft = softmax_W * softmax_H; one EUP reciprocal covers both denominators.
    x_soft = (e_w * e_h) * pl.reciprocal(s_w * s_h, approx=True)

    # 1 - x_gumbel == 1 - x_hard  (the -x_soft + x_soft cancels; <= 1 ulp vs PyTorch)
    thresh = 1.5 / float(H * W)
    o_ref[...] = jnp.where(x_soft > thresh, 0.0, 1.0).astype(o_ref.dtype)


def gumbel_distractor(x, weights, biases):
    """x: (B, 1, H, W) f32; weights: (n_layers, 1, 1, 3, 3); biases: (n_layers,)."""
    B, C, H, W = x.shape
    assert C == 1, "GumbelDistractor uses Conv2d(1, 1, ...); C must be 1"
    n_layers = int(biases.shape[0])
    # TODO(synk): add a fallback path for W that does not divide 128 (non power of two).
    assert 128 % W == 0, "lane-packed kernel needs W to be a power of two <= 128"

    LP = 128 // W            # images packed side by side along the lane axis
    LPW = LP * W             # == 128

    x3 = x.reshape(B, H, W).astype(jnp.float32)

    # Number of lane-packed groups and groups per block (~1 MiB blocks, and at
    # least 2 grid steps when possible so both v7x TensorCores stay busy).
    G = -(-B // LP)
    bytes_per_group = H * LPW * 4
    TG = max(1, min((1 << 20) // bytes_per_group, G))
    if G > 1:
        TG = min(TG, -(-G // 2))
    G_pad = -(-G // TG) * TG
    B_pad = G_pad * LP

    if B_pad != B:
        x3 = jnp.concatenate(
            [x3, jnp.zeros((B_pad - B, H, W), jnp.float32)], axis=0)

    # Lane-pack: (B_pad, H, W) -> (G_pad, H, LP*W) with LP images per 128 lanes.
    xp = x3.reshape(G_pad, LP, H, W).transpose(0, 2, 1, 3).reshape(G_pad, H, LPW)

    w_flat = weights.reshape(-1).astype(jnp.float32)     # (n_layers*9,)
    b_flat = biases.reshape(-1).astype(jnp.float32)      # (n_layers,)

    kern = functools.partial(
        _gumbel_distractor_kernel, n_layers=n_layers, H=H, W=W, LP=LP)

    out = pl.pallas_call(
        kern,
        out_shape=jax.ShapeDtypeStruct((G_pad, H, LPW), jnp.float32),
        grid=(G_pad // TG,),
        in_specs=[
            pl.BlockSpec(memory_space=pltpu.SMEM),              # conv weights
            pl.BlockSpec(memory_space=pltpu.SMEM),              # conv biases
            pl.BlockSpec((TG, H, LPW), lambda g: (g, 0, 0)),    # TG groups per step
        ],
        out_specs=pl.BlockSpec((TG, H, LPW), lambda g: (g, 0, 0)),
        compiler_params=pltpu.CompilerParams(
            dimension_semantics=("parallel",),
            vmem_limit_bytes=48 * 1024 * 1024,
        ),
    )(w_flat, b_flat, xp)

    # Unpack lanes back to (B, 1, H, W).
    out = out.reshape(G_pad, H, LP, W).transpose(0, 2, 1, 3).reshape(B_pad, H, W)
    return out[:B].reshape(B, 1, H, W)


def _reference(x, weights, biases):
    """Pure-JAX forward matching the PyTorch module (exact softmax / divides)."""
    y = x.astype(jnp.float32)
    for l in range(int(biases.shape[0])):
        y = jax.lax.conv_general_dilated(
            y, weights[l].astype(jnp.float32), window_strides=(1, 1),
            padding="SAME", dimension_numbers=("NCHW", "OIHW", "NCHW"))
        y = y + biases[l]
    sw = jax.nn.softmax(y, axis=-1)
    sh = jax.nn.softmax(y, axis=-2)
    x_soft = sw * sh
    n = y.shape[-1] * y.shape[-2]
    x_hard = (x_soft > 1.5 / n).astype(jnp.float32)
    x_gumbel = x_hard - jax.lax.stop_gradient(x_soft) + x_soft
    return 1.0 - x_gumbel


if __name__ == "__main__":
    key = jax.random.PRNGKey(0)
    kx, kw, kb = jax.random.split(key, 3)

    B, H, W = 2, 16, 16
    n_layers = 1

    # Conv2d(1, 1, 3) shaped params with a kaiming-uniform-ish bound.
    fan_in = 1 * 3 * 3
    bound = 1.0 / (fan_in ** 0.5)
    weights = jax.random.uniform(
        kw, (n_layers, 1, 1, 3, 3), jnp.float32, minval=-bound, maxval=bound)
    biases = jax.random.uniform(
        kb, (n_layers,), jnp.float32, minval=-bound, maxval=bound)
    x = jax.random.normal(kx, (B, 1, H, W), jnp.float32)

    out = gumbel_distractor(x, weights, biases)
    jax.block_until_ready(out)
    assert out.shape == (B, 1, H, W)

    # The kernel uses an approximate reciprocal, so elements sitting exactly at
    # the 1.5/(H*W) threshold may legitimately flip; require >= 99% agreement.
    ref = _reference(x, weights, biases)
    agree = float(jnp.mean((jnp.round(out) == jnp.round(ref)).astype(jnp.float32)))
    assert agree >= 0.99, f"binary agreement with reference too low: {agree}"
    print("KERNEL_OK")
</pallas_src>

<mosaic_0001>
module attributes {stable_mosaic.version = 11 : i64} {
  func.func @_gumbel_distractor_kernel(%arg0: i32, %arg1: memref<9xf32, #tpu.memory_space<smem>>, %arg2: memref<1xf32, #tpu.memory_space<smem>>, %arg3: memref<1x16x128xf32, #tpu.memory_space<vmem>>, %arg4: memref<1x16x128xf32, #tpu.memory_space<vmem>>) attributes {dimension_semantics = [#tpu.dimension_semantics<parallel>], iteration_bounds = array<i64: 1>, scalar_prefetch = 0 : i64, scratch_operands = 0 : i64, tpu.core_type = #tpu.core_type<tc>, window_params = [{transform_indices = @transform_0, window_bounds = array<i64: 9>}, {transform_indices = @transform_1, window_bounds = array<i64: 1>}, {transform_indices = @transform_2, window_bounds = array<i64: 1, 16, 128>}, {transform_indices = @transform_3, window_bounds = array<i64: 1, 16, 128>}]} {
    %c0 = arith.constant 0 : index
    %c0_0 = arith.constant 0 : index
    %c0_1 = arith.constant 0 : index
    %0 = vector.load %arg3[%c0, %c0_0, %c0_1] : memref<1x16x128xf32, #tpu.memory_space<vmem>>, vector<1x16x128xf32>
    %1 = tpu.iota {dimensions = array<i32: 1>} : vector<1x16x128xi32>
    %2 = tpu.iota {dimensions = array<i32: 2>} : vector<1x16x128xi32>
    %c15_i32 = arith.constant 15 : i32
    %3 = vector.broadcast %c15_i32 : i32 to vector<1x16x128xi32>
    %4 = arith.andi %2, %3 : vector<1x16x128xi32>
    %c0_i32 = arith.constant 0 : i32
    %5 = vector.broadcast %c0_i32 : i32 to vector<1x16x128xi32>
    %6 = arith.cmpi sgt, %1, %5 : vector<1x16x128xi32>
    %c15_i32_2 = arith.constant 15 : i32
    %7 = vector.broadcast %c15_i32_2 : i32 to vector<1x16x128xi32>
    %8 = arith.cmpi slt, %1, %7 : vector<1x16x128xi32>
    %c0_i32_3 = arith.constant 0 : i32
    %9 = vector.broadcast %c0_i32_3 : i32 to vector<1x16x128xi32>
    %10 = arith.cmpi sgt, %4, %9 : vector<1x16x128xi32>
    %c15_i32_4 = arith.constant 15 : i32
    %11 = vector.broadcast %c15_i32_4 : i32 to vector<1x16x128xi32>
    %12 = arith.cmpi slt, %4, %11 : vector<1x16x128xi32>
    %c1_i32 = arith.constant 1 : i32
    %13 = tpu.dynamic_rotate %0 by %c1_i32 dim 1 : vector<1x16x128xf32>, i32 -> vector<1x16x128xf32>
    %cst = arith.constant 0.000000e+00 : f32
    %14 = vector.broadcast %cst : f32 to vector<1x16x128xf32>
    %15 = arith.select %6, %13, %14 : vector<1x16x128xi1>, vector<1x16x128xf32>
    %c15_i32_5 = arith.constant 15 : i32
    %16 = tpu.dynamic_rotate %0 by %c15_i32_5 dim 1 : vector<1x16x128xf32>, i32 -> vector<1x16x128xf32>
    %cst_6 = arith.constant 0.000000e+00 : f32
    %17 = vector.broadcast %cst_6 : f32 to vector<1x16x128xf32>
    %18 = arith.select %8, %16, %17 : vector<1x16x128xi1>, vector<1x16x128xf32>
    %c0_7 = arith.constant 0 : index
    %19 = memref.load %arg2[%c0_7] : memref<1xf32, #tpu.memory_space<smem>>
    %20 = vector.broadcast %19 : f32 to vector<1x16x128xf32>
    %c1_i32_8 = arith.constant 1 : i32
    %21 = tpu.dynamic_rotate %15 by %c1_i32_8 dim 2 : vector<1x16x128xf32>, i32 -> vector<1x16x128xf32>
    %cst_9 = arith.constant 0.000000e+00 : f32
    %22 = vector.broadcast %cst_9 : f32 to vector<1x16x128xf32>
    %23 = arith.select %10, %21, %22 : vector<1x16x128xi1>, vector<1x16x128xf32>
    %c0_10 = arith.constant 0 : index
    %24 = memref.load %arg1[%c0_10] : memref<9xf32, #tpu.memory_space<smem>>
    %25 = vector.broadcast %24 : f32 to vector<1x16x128xf32>
    %26 = arith.mulf %25, %23 : vector<1x16x128xf32>
    %27 = arith.addf %20, %26 : vector<1x16x128xf32>
    %c1 = arith.constant 1 : index
    %28 = memref.load %arg1[%c1] : memref<9xf32, #tpu.memory_space<smem>>
    %29 = vector.broadcast %28 : f32 to vector<1x16x128xf32>
    %30 = arith.mulf %29, %15 : vector<1x16x128xf32>
    %31 = arith.addf %27, %30 : vector<1x16x128xf32>
    %c127_i32 = arith.constant 127 : i32
    %32 = tpu.dynamic_rotate %15 by %c127_i32 dim 2 : vector<1x16x128xf32>, i32 -> vector<1x16x128xf32>
    %cst_11 = arith.constant 0.000000e+00 : f32
    %33 = vector.broadcast %cst_11 : f32 to vector<1x16x128xf32>
    %34 = arith.select %12, %32, %33 : vector<1x16x128xi1>, vector<1x16x128xf32>
    %c2 = arith.constant 2 : index
    %35 = memref.load %arg1[%c2] : memref<9xf32, #tpu.memory_space<smem>>
    %36 = vector.broadcast %35 : f32 to vector<1x16x128xf32>
    %37 = arith.mulf %36, %34 : vector<1x16x128xf32>
    %38 = arith.addf %31, %37 : vector<1x16x128xf32>
    %c1_i32_12 = arith.constant 1 : i32
    %39 = tpu.dynamic_rotate %0 by %c1_i32_12 dim 2 : vector<1x16x128xf32>, i32 -> vector<1x16x128xf32>
    %cst_13 = arith.constant 0.000000e+00 : f32
    %40 = vector.broadcast %cst_13 : f32 to vector<1x16x128xf32>
    %41 = arith.select %10, %39, %40 : vector<1x16x128xi1>, vector<1x16x128xf32>
    %c3 = arith.constant 3 : index
    %42 = memref.load %arg1[%c3] : memref<9xf32, #tpu.memory_space<smem>>
    %43 = vector.broadcast %42 : f32 to vector<1x16x128xf32>
    %44 = arith.mulf %43, %41 : vector<1x16x128xf32>
    %45 = arith.addf %38, %44 : vector<1x16x128xf32>
    %c4 = arith.constant 4 : index
    %46 = memref.load %arg1[%c4] : memref<9xf32, #tpu.memory_space<smem>>
    %47 = vector.broadcast %46 : f32 to vector<1x16x128xf32>
    %48 = arith.mulf %47, %0 : vector<1x16x128xf32>
    %49 = arith.addf %45, %48 : vector<1x16x128xf32>
    %c127_i32_14 = arith.constant 127 : i32
    %50 = tpu.dynamic_rotate %0 by %c127_i32_14 dim 2 : vector<1x16x128xf32>, i32 -> vector<1x16x128xf32>
    %cst_15 = arith.constant 0.000000e+00 : f32
    %51 = vector.broadcast %cst_15 : f32 to vector<1x16x128xf32>
    %52 = arith.select %12, %50, %51 : vector<1x16x128xi1>, vector<1x16x128xf32>
    %c5 = arith.constant 5 : index
    %53 = memref.load %arg1[%c5] : memref<9xf32, #tpu.memory_space<smem>>
    %54 = vector.broadcast %53 : f32 to vector<1x16x128xf32>
    %55 = arith.mulf %54, %52 : vector<1x16x128xf32>
    %56 = arith.addf %49, %55 : vector<1x16x128xf32>
    %c1_i32_16 = arith.constant 1 : i32
    %57 = tpu.dynamic_rotate %18 by %c1_i32_16 dim 2 : vector<1x16x128xf32>, i32 -> vector<1x16x128xf32>
    %cst_17 = arith.constant 0.000000e+00 : f32
    %58 = vector.broadcast %cst_17 : f32 to vector<1x16x128xf32>
    %59 = arith.select %10, %57, %58 : vector<1x16x128xi1>, vector<1x16x128xf32>
    %c6 = arith.constant 6 : index
    %60 = memref.load %arg1[%c6] : memref<9xf32, #tpu.memory_space<smem>>
    %61 = vector.broadcast %60 : f32 to vector<1x16x128xf32>
    %62 = arith.mulf %61, %59 : vector<1x16x128xf32>
    %63 = arith.addf %56, %62 : vector<1x16x128xf32>
    %c7 = arith.constant 7 : index
    %64 = memref.load %arg1[%c7] : memref<9xf32, #tpu.memory_space<smem>>
    %65 = vector.broadcast %64 : f32 to vector<1x16x128xf32>
    %66 = arith.mulf %65, %18 : vector<1x16x128xf32>
    %67 = arith.addf %63, %66 : vector<1x16x128xf32>
    %c127_i32_18 = arith.constant 127 : i32
    %68 = tpu.dynamic_rotate %18 by %c127_i32_18 dim 2 : vector<1x16x128xf32>, i32 -> vector<1x16x128xf32>
    %cst_19 = arith.constant 0.000000e+00 : f32
    %69 = vector.broadcast %cst_19 : f32 to vector<1x16x128xf32>
    %70 = arith.select %12, %68, %69 : vector<1x16x128xi1>, vector<1x16x128xf32>
    %c8 = arith.constant 8 : index
    %71 = memref.load %arg1[%c8] : memref<9xf32, #tpu.memory_space<smem>>
    %72 = vector.broadcast %71 : f32 to vector<1x16x128xf32>
    %73 = arith.mulf %72, %70 : vector<1x16x128xf32>
    %74 = arith.addf %67, %73 : vector<1x16x128xf32>
    %c1_i32_20 = arith.constant 1 : i32
    %75 = tpu.dynamic_rotate %74 by %c1_i32_20 dim 2 : vector<1x16x128xf32>, i32 -> vector<1x16x128xf32>
    %c113_i32 = arith.constant 113 : i32
    %76 = tpu.dynamic_rotate %74 by %c113_i32 dim 2 : vector<1x16x128xf32>, i32 -> vector<1x16x128xf32>
    %c1_i32_21 = arith.constant 1 : i32
    %77 = vector.broadcast %c1_i32_21 : i32 to vector<1x16x128xi32>
    %78 = arith.cmpi sge, %4, %77 : vector<1x16x128xi32>
    %79 = arith.select %78, %75, %76 : vector<1x16x128xi1>, vector<1x16x128xf32>
    %80 = arith.maximumf %74, %79 : vector<1x16x128xf32>
    %c2_i32 = arith.constant 2 : i32
    %81 = tpu.dynamic_rotate %80 by %c2_i32 dim 2 : vector<1x16x128xf32>, i32 -> vector<1x16x128xf32>
    %c114_i32 = arith.constant 114 : i32
    %82 = tpu.dynamic_rotate %80 by %c114_i32 dim 2 : vector<1x16x128xf32>, i32 -> vector<1x16x128xf32>
    %c2_i32_22 = arith.constant 2 : i32
    %83 = vector.broadcast %c2_i32_22 : i32 to vector<1x16x128xi32>
    %84 = arith.cmpi sge, %4, %83 : vector<1x16x128xi32>
    %85 = arith.select %84, %81, %82 : vector<1x16x128xi1>, vector<1x16x128xf32>
    %86 = arith.maximumf %80, %85 : vector<1x16x128xf32>
    %c4_i32 = arith.constant 4 : i32
    %87 = tpu.dynamic_rotate %86 by %c4_i32 dim 2 : vector<1x16x128xf32>, i32 -> vector<1x16x128xf32>
    %c116_i32 = arith.constant 116 : i32
    %88 = tpu.dynamic_rotate %86 by %c116_i32 dim 2 : vector<1x16x128xf32>, i32 -> vector<1x16x128xf32>
    %c4_i32_23 = arith.constant 4 : i32
    %89 = vector.broadcast %c4_i32_23 : i32 to vector<1x16x128xi32>
    %90 = arith.cmpi sge, %4, %89 : vector<1x16x128xi32>
    %91 = arith.select %90, %87, %88 : vector<1x16x128xi1>, vector<1x16x128xf32>
    %92 = arith.maximumf %86, %91 : vector<1x16x128xf32>
    %c8_i32 = arith.constant 8 : i32
    %93 = tpu.dynamic_rotate %92 by %c8_i32 dim 2 : vector<1x16x128xf32>, i32 -> vector<1x16x128xf32>
    %c120_i32 = arith.constant 120 : i32
    %94 = tpu.dynamic_rotate %92 by %c120_i32 dim 2 : vector<1x16x128xf32>, i32 -> vector<1x16x128xf32>
    %c8_i32_24 = arith.constant 8 : i32
    %95 = vector.broadcast %c8_i32_24 : i32 to vector<1x16x128xi32>
    %96 = arith.cmpi sge, %4, %95 : vector<1x16x128xi32>
    %97 = arith.select %96, %93, %94 : vector<1x16x128xi1>, vector<1x16x128xf32>
    %98 = arith.maximumf %92, %97 : vector<1x16x128xf32>
    %99 = arith.subf %74, %98 : vector<1x16x128xf32>
    %100 = math.exp %99 : vector<1x16x128xf32>
    %c1_i32_25 = arith.constant 1 : i32
    %101 = tpu.dynamic_rotate %100 by %c1_i32_25 dim 2 : vector<1x16x128xf32>, i32 -> vector<1x16x128xf32>
    %c113_i32_26 = arith.constant 113 : i32
    %102 = tpu.dynamic_rotate %100 by %c113_i32_26 dim 2 : vector<1x16x128xf32>, i32 -> vector<1x16x128xf32>
    %c1_i32_27 = arith.constant 1 : i32
    %103 = vector.broadcast %c1_i32_27 : i32 to vector<1x16x128xi32>
    %104 = arith.cmpi sge, %4, %103 : vector<1x16x128xi32>
    %105 = arith.select %104, %101, %102 : vector<1x16x128xi1>, vector<1x16x128xf32>
    %106 = arith.addf %100, %105 : vector<1x16x128xf32>
    %c2_i32_28 = arith.constant 2 : i32
    %107 = tpu.dynamic_rotate %106 by %c2_i32_28 dim 2 : vector<1x16x128xf32>, i32 -> vector<1x16x128xf32>
    %c114_i32_29 = arith.constant 114 : i32
    %108 = tpu.dynamic_rotate %106 by %c114_i32_29 dim 2 : vector<1x16x128xf32>, i32 -> vector<1x16x128xf32>
    %c2_i32_30 = arith.constant 2 : i32
    %109 = vector.broadcast %c2_i32_30 : i32 to vector<1x16x128xi32>
    %110 = arith.cmpi sge, %4, %109 : vector<1x16x128xi32>
    %111 = arith.select %110, %107, %108 : vector<1x16x128xi1>, vector<1x16x128xf32>
    %112 = arith.addf %106, %111 : vector<1x16x128xf32>
    %c4_i32_31 = arith.constant 4 : i32
    %113 = tpu.dynamic_rotate %112 by %c4_i32_31 dim 2 : vector<1x16x128xf32>, i32 -> vector<1x16x128xf32>
    %c116_i32_32 = arith.constant 116 : i32
    %114 = tpu.dynamic_rotate %112 by %c116_i32_32 dim 2 : vector<1x16x128xf32>, i32 -> vector<1x16x128xf32>
    %c4_i32_33 = arith.constant 4 : i32
    %115 = vector.broadcast %c4_i32_33 : i32 to vector<1x16x128xi32>
    %116 = arith.cmpi sge, %4, %115 : vector<1x16x128xi32>
    %117 = arith.select %116, %113, %114 : vector<1x16x128xi1>, vector<1x16x128xf32>
    %118 = arith.addf %112, %117 : vector<1x16x128xf32>
    %c8_i32_34 = arith.constant 8 : i32
    %119 = tpu.dynamic_rotate %118 by %c8_i32_34 dim 2 : vector<1x16x128xf32>, i32 -> vector<1x16x128xf32>
    %c120_i32_35 = arith.constant 120 : i32
    %120 = tpu.dynamic_rotate %118 by %c120_i32_35 dim 2 : vector<1x16x128xf32>, i32 -> vector<1x16x128xf32>
    %c8_i32_36 = arith.constant 8 : i32
    %121 = vector.broadcast %c8_i32_36 : i32 to vector<1x16x128xi32>
    %122 = arith.cmpi sge, %4, %121 : vector<1x16x128xi32>
    %123 = arith.select %122, %119, %120 : vector<1x16x128xi1>, vector<1x16x128xf32>
    %124 = arith.addf %118, %123 : vector<1x16x128xf32>
    %cst_37 = arith.constant dense<0xFF800000> : vector<1x128xf32>
    %125 = vector.multi_reduction <maximumf>, %74, %cst_37 [1] : vector<1x16x128xf32> to vector<1x128xf32>
    %126 = vector.shape_cast %125 : vector<1x128xf32> to vector<1x1x128xf32>
    %127 = vector.broadcast %126 : vector<1x1x128xf32> to vector<1x16x128xf32>
    %128 = arith.subf %74, %127 : vector<1x16x128xf32>
    %129 = math.exp %128 : vector<1x16x128xf32>
    %cst_38 = arith.constant dense<0.000000e+00> : vector<1x128xf32>
    %130 = vector.multi_reduction <add>, %129, %cst_38 [1] : vector<1x16x128xf32> to vector<1x128xf32>
    %131 = vector.shape_cast %130 : vector<1x128xf32> to vector<1x1x128xf32>
    %132 = arith.mulf %100, %129 : vector<1x16x128xf32>
    %133 = vector.broadcast %131 : vector<1x1x128xf32> to vector<1x16x128xf32>
    %134 = arith.mulf %124, %133 : vector<1x16x128xf32>
    %135 = tpu.reciprocal %134 {approx = true} : vector<1x16x128xf32> -> vector<1x16x128xf32>
    %136 = arith.mulf %132, %135 : vector<1x16x128xf32>
    %cst_39 = arith.constant 0.005859375 : f32
    %137 = vector.broadcast %cst_39 : f32 to vector<1x16x128xf32>
    %138 = arith.cmpf ogt, %136, %137 : vector<1x16x128xf32>
    %cst_40 = arith.constant 0.000000e+00 : f32
    %cst_41 = arith.constant 1.000000e+00 : f32
    %139 = vector.broadcast %cst_40 : f32 to vector<1x16x128xf32>
    %140 = vector.broadcast %cst_41 : f32 to vector<1x16x128xf32>
    %141 = arith.select %138, %139, %140 : vector<1x16x128xi1>, vector<1x16x128xf32>
    %c0_42 = arith.constant 0 : index
    %c0_43 = arith.constant 0 : index
    %c0_44 = arith.constant 0 : index
    %142 = vector.load %arg4[%c0_42, %c0_43, %c0_44] : memref<1x16x128xf32, #tpu.memory_space<vmem>>, vector<1x16x128xf32>
    tpu.vector_store %arg4[%c0_42, %c0_43, %c0_44], %141 {strides = array<i32>} : memref<1x16x128xf32, #tpu.memory_space<vmem>>, vector<1x16x128xf32>,
    return
  }
  func.func @transform_0(%arg0: i32) -> i32 {
    %c0_i32 = arith.constant 0 : i32
    %c0_i32_0 = arith.constant 0 : i32
    return %c0_i32 : i32
  }
  func.func @transform_1(%arg0: i32) -> i32 {
    %c0_i32 = arith.constant 0 : i32
    %c0_i32_0 = arith.constant 0 : i32
    return %c0_i32 : i32
  }
  func.func @transform_2(%arg0: i32) -> (i32, i32, i32) {
    %c0_i32 = arith.constant 0 : i32
    %c0_i32_0 = arith.constant 0 : i32
    %c0_i32_1 = arith.constant 0 : i32
    return %arg0, %c0_i32, %c0_i32_0 : i32, i32, i32
  }
  func.func @transform_3(%arg0: i32) -> (i32, i32, i32) {
    %c0_i32 = arith.constant 0 : i32
    %c0_i32_0 = arith.constant 0 : i32
    %c0_i32_1 = arith.constant 0 : i32
    return %arg0, %c0_i32, %c0_i32_0 : i32, i32, i32
  }
}

</mosaic_0001>

<bundles_post_ra>
// kernel: tpu_custom_call.1
= control target key start
LH: loop header
LB: loop body
LE: loop exit
PB: predicated region body
PF: predicated region fallthrough
CT: control target
= control target key end

     0   :  { %9 = vsyncpa [#allocation6], 0  ;;  %s662_s0 = inlined_call_operand.vmem [shape: f32[9], index: 0, kind: input, shape index: {}]   ;;  %s663_s1 = inlined_call_operand.<no memory space> [shape: f32[1], index: 1, kind: input, shape index: {}]   ;;  %s664_s2 = inlined_call_operand.hbm [shape: f32[1,16,128], index: 2, kind: input, shape index: {}]   ;;  %s665_s3 = inlined_call_operand.hbm [shape: f32[1,16,128], index: 3, kind: output, shape index: {}]  }
   0x1   :  { %10 = vsyncpa [#allocation4], 0 }
   0x2   :  { %11 = vsyncpa [#allocation5], 0  ;;  %s18_s14 = sshll.u32 %s662_s0, 4  ;;  %s19_s14 = int_to_ptr.vmem [resolvable:$true] %s18_s14 }
   0x3   :  { %s355_s15 = scalar_lea.vmem %s19_s14, 16  ;;  %p360_p1 = scmp.lt.s32.totalorder %s19_s14, %s19_s14 }
   0x4   :  { %p356_p0 = scmp.ne.s32.totalorder %s19_s14, %s355_s15  ;;  %p361_p2 = scmp.lt.s32.totalorder %s355_s15, %s355_s15 }
   0x6   :  { %p362_p3 = por %p361_p2, %p360_p1 }
   0x8   :  { %p363_p4 = pnand %p362_p3, %p356_p0 }
   0xa   :  { %366 = shalt.err (!%p363_p4)
}
   0xb   :  { %s417_s16 = smov [#allocation3]   ;;  %s418_s17 = smov [#allocation7]  }
   0xc   :  { %21 = dma.vmem_to_smem %s19_s14, 16, %s417_s16, [#allocation6]  }
   0xd   :  { %s29_s18 = sshll.u32 %s418_s17, 4  ;;  %s367_s21 = scalar_lea.hbm %s664_s2, 256  ;;  %s30_s18 = int_to_ptr.vmem [resolvable:$true] %s29_s18 }
   0xe   :  { %p368_p5 = scmp.ne.s32.totalorder %s664_s2, %s367_s21  ;;  %p371_p6 = scmp.lt.u32.totalorder %s367_s21, %s664_s2 }
  0x10   :  { %p373_p7 = pnand %p371_p6, %p368_p5 }
  0x12   :  { %376 = shalt.err (!%p373_p7)
}
  0x13   :  { %s377_s25 = scalar_lea.vmem %s30_s18, 256  ;;  %p382_p9 = scmp.lt.s32.totalorder %s30_s18, %s30_s18 }
  0x14   :  { %p378_p8 = scmp.ne.s32.totalorder %s30_s18, %s377_s25  ;;  %p383_p10 = scmp.lt.s32.totalorder %s377_s25, %s377_s25 }
  0x16   :  { %p384_p11 = por %p383_p10, %p382_p9 }
  0x18   :  { %p385_p12 = pnand %p384_p11, %p378_p8 }
  0x1a   :  { %388 = shalt.err (!%p385_p12)
}
  0x1b   :  { %s419_s26 = smov 128   ;;  %s420_s27 = smov 8  }
  0x1c   :  { %35 = dma.hbm_to_vmem [thread:$0]  %s664_s2, 256, %s30_s18, [#allocation4], %s419_s26, %s419_s26, %s420_s27  }
  0x1d   :  { %411 = dma.done.wait [#allocation6], 16  }
  0x1e   :  { %412 = vsyncadd [#allocation6], 4294967280 }
  0x1f   :  { %413 = dma.done.wait [#allocation4], 256  }
  0x20   :  { %414 = vsyncadd [#allocation4], 4294967040 }
  0x21   :  { %42 = sfence }
  0x22   :  { %v469_v0 = vld [vmem:[#allocation7] sm:$0xff]  ;;  %v471_v1 = vld [vmem:[#allocation7 + $0x8] sm:$0xff]  ;;  %v45_v2 = vlaneseq  ;;  %s421_s2 = smov 127   ;;  %s422_s30 = smov 1   ;;  %v72_v21 = vstv %s663_s1 }
  0x23   :  { %v57_v3 = vrot.slane %v469_v0, 7  ;;  %v58_v4 = vrot.slane %v471_v1, 7  ;;  %v64_v10 = vrot.slane %v469_v0, 1  ;;  %v65_v11 = vrot.slane %v471_v1, 1  ;;  %s321_s4 = sld [smem:[#allocation3 + $0x1]]  ;;  %s79_s5 = sld [smem:[#allocation3]] }
  0x24   :  { %v46_v5 = vshrl.u32 %v45_v2, 7  ;;  %v49_v15 = vand.u32 127, %v45_v2  ;;  %s497_s6 = sld [smem:[#allocation3 + $0x2]]  ;;  %s500_s7 = sld [smem:[#allocation3 + $0x4]] }
  0x25   :  { %s502_s8 = sld [smem:[#allocation3 + $0x3]]  ;;  %s510_s11 = sld [smem:[#allocation3 + $0x5]] }
  0x26   :  { %vm59_vm0 = vcmp.lt.s32.totalorder %v46_v5, 1  ;;  %vm51_vm1 = vcmp.gt.s32.totalorder %v46_v5, 0  ;;  %v47_v9 = vadd.s32 8, %v46_v5  ;;  %vm66_vm2 = vcmp.lt.s32.totalorder %v46_v5, 7  ;;  %s517_s1 = sld [smem:[#allocation3 + $0x7]]  ;;  %s523_s12 = sld [smem:[#allocation3 + $0x6]] }
  0x27   :  { %v60_v6 = vsel %vm59_vm0, %v57_v3, %v58_v4  ;;  %v61_v7 = vsel %vm59_vm0, %v58_v4, %v57_v3  ;;  %v68_v12 = vsel %vm66_vm2, %v65_v11, %v64_v10  ;;  %v487_v14 = vsel %vm66_vm2, %v64_v10, %v65_v11  ;;  %s531_s13 = sld [smem:[#allocation3 + $0x8]]  ;;  %s423_s14 = smov 113  }
  0x28   :  { %93 = vrot.lane.b32.xlu1 %v60_v6, %s421_s2  ;;  %75 = vrot.lane.b32.xlu0 %v60_v6, %s422_s30  ;;  %v62_v8 = vsel %vm51_vm1, %v61_v7, 0.0  ;;  %vm54_vm3 = vcmp.lt.s32.totalorder %v47_v9, 15  ;;  %v495_v16 = vand.u32 15, %v49_v15  ;;  %s424_s15 = smov 2   ;;  %s425_s16 = smov 114  }
  0x29   :  { %v485_v13 = vsel %vm54_vm3, %v68_v12, 0.0  ;;  %v86_v17 = vstv %s321_s4  ;;  %v80_v18 = vstv %s79_s5  ;;  %s426_s17 = smov 4   ;;  %s427_s18 = smov 116  }
  0x2a   :  { %vm55_vm4 = vcmp.gt.s32.totalorder %v495_v16, 0  ;;  %v88_v23 = vmul.f32 %v86_v17, %v60_v6  ;;  %vm56_vm5 = vcmp.lt.s32.totalorder %v495_v16, 15  ;;  %v98_v28 = vstv %s497_s6  ;;  %s428_s19 = smov 120   ;;  %s429_s20 = smov [#allocation8]  }
  0x2b   :  { %v87_v31 = vmul.f32 %v86_v17, %v62_v8  ;;  %v116_v34 = vstv %s500_s7  ;;  %v110_v36 = vstv %s502_s8  ;;  %v128_v48 = vstv %s510_s11  ;;  %s308_s21 = sshll.u32 %s429_s20, 4  ;;  %s309_s21 = int_to_ptr.vmem [resolvable:$true] %s308_s21 }
  0x2c   :  { %91 = vrot.lane.b32.xlu1 %v62_v8, %s421_s2  ;;  %73 = vrot.lane.b32.xlu0 %v62_v8, %s422_s30  ;;  %v118_v43 = vmul.f32 %v116_v34, %v471_v1  ;;  %v117_v53 = vmul.f32 %v116_v34, %v469_v0  ;;  %v146_v57 = vstv %s517_s1  ;;  %v140_v61 = vstv %s523_s12  ;;  %s389_s22 = scalar_lea.vmem %s309_s21, 256  ;;  %p394_p0 = scmp.lt.s32.totalorder %s309_s21, %s309_s21 }
  0x2d   :  { %v148_v3 = vmul.f32 %v146_v57, %v485_v13  ;;  %v158_v10 = vstv %s531_s13  ;;  %vm171_vm6 = vcmp.ge.s32.totalorder %v495_v16, 1  ;;  %vm184_vm7 = vcmp.ge.s32.totalorder %v495_v16, 2  ;;  %p390_p13 = scmp.ne.s32.totalorder %s309_s21, %s389_s22  ;;  %p395_p1 = scmp.lt.s32.totalorder %s389_s22, %s389_s22 }
  0x2e   :  { %vm197_vm8 = vcmp.ge.s32.totalorder %v495_v16, 4  ;;  %vm210_vm9 = vcmp.ge.s32.totalorder %v495_v16, 8 }
  0x2f   :  { %p396_p2 = por %p395_p1, %p394_p0 }
  0x30   :  { %105 = vrot.lane.b32.xlu1 %v471_v1, %s422_s30  ;;  %103 = vrot.lane.b32.xlu0 %v469_v0, %s422_s30 }
  0x31   :  { %p397_p3 = pnand %p396_p2, %p390_p13 }
  0x34   :  { %123 = vrot.lane.b32.xlu1 %v471_v1, %s421_s2  ;;  %121 = vrot.lane.b32.xlu0 %v469_v0, %s421_s2  ;;  %v147_v0 = vmul.f32 %v146_v57, %v487_v14 }
  0x38   :  { %135 = vrot.lane.b32.xlu1 %v485_v13, %s422_s30  ;;  %133 = vrot.lane.b32.xlu0 %v487_v14, %s422_s30 }
  0x3c   :  { %153 = vrot.lane.b32.xlu1 %v485_v13, %s421_s2  ;;  %151 = vrot.lane.b32.xlu0 %v487_v14, %s421_s2 }
  0x9a   :  { %v94_v19 = vpop.permute.xlu1 %93  ;;  %v76_v20 = vpop.permute.xlu0 %75 }
  0x9b   :  { %v78_v22 = vsel %vm55_vm4, %v76_v20, 0.0  ;;  %v96_v29 = vsel %vm56_vm5, %v94_v19, 0.0 }
  0x9c   :  { %v82_v24 = vmul.f32 %v80_v18, %v78_v22  ;;  %v100_v37 = vmul.f32 %v98_v28, %v96_v29 }
  0x9e   :  { %v84_v25 = vadd.f32 %v82_v24, %v72_v21  ;;  %v92_v26 = vpop.permute.xlu1 %91  ;;  %v74_v27 = vpop.permute.xlu0 %73 }
  0x9f   :  { %v77_v30 = vsel %vm55_vm4, %v74_v27, 0.0  ;;  %v95_v35 = vsel %vm56_vm5, %v92_v26, 0.0 }
  0xa0   :  { %v90_v32 = vadd.f32 %v88_v23, %v84_v25  ;;  %v81_v33 = vmul.f32 %v80_v18, %v77_v30  ;;  %v99_v44 = vmul.f32 %v98_v28, %v95_v35 }
  0xa2   :  { %v83_v38 = vadd.f32 %v81_v33, %v72_v21  ;;  %v106_v39 = vpop.permute.xlu1 %105  ;;  %v104_v40 = vpop.permute.xlu0 %103  ;;  %v102_v46 = vadd.f32 %v100_v37, %v90_v32 }
  0xa3   :  { %v108_v41 = vsel %vm55_vm4, %v106_v39, 0.0  ;;  %v107_v42 = vsel %vm55_vm4, %v104_v40, 0.0 }
  0xa4   :  { %v89_v45 = vadd.f32 %v87_v31, %v83_v38  ;;  %v112_v47 = vmul.f32 %v110_v36, %v108_v41  ;;  %v111_v51 = vmul.f32 %v110_v36, %v107_v42 }
  0xa6   :  { %v114_v49 = vadd.f32 %v112_v47, %v102_v46  ;;  %v101_v50 = vadd.f32 %v99_v44, %v89_v45  ;;  %v124_v52 = vpop.permute.xlu1 %123  ;;  %v122_v54 = vpop.permute.xlu0 %121 }
  0xa7   :  { %v126_v55 = vsel %vm56_vm5, %v124_v52, 0.0  ;;  %v125_v56 = vsel %vm56_vm5, %v122_v54, 0.0 }
  0xa8   :  { %v113_v58 = vadd.f32 %v111_v51, %v101_v50  ;;  %v120_v59 = vadd.f32 %v118_v43, %v114_v49  ;;  %v130_v60 = vmul.f32 %v128_v48, %v126_v55  ;;  %v129_v63 = vmul.f32 %v128_v48, %v125_v56 }
  0xaa   :  { %v119_v62 = vadd.f32 %v117_v53, %v113_v58  ;;  %v136_v1 = vpop.permute.xlu1 %135  ;;  %v134_v2 = vpop.permute.xlu0 %133  ;;  %v132_v6 = vadd.f32 %v130_v60, %v120_v59 }
  0xab   :  { %v138_v4 = vsel %vm55_vm4, %v136_v1, 0.0  ;;  %v137_v5 = vsel %vm55_vm4, %v134_v2, 0.0 }
  0xac   :  { %v131_v7 = vadd.f32 %v129_v63, %v119_v62  ;;  %v142_v8 = vmul.f32 %v140_v61, %v138_v4  ;;  %v141_v9 = vmul.f32 %v140_v61, %v137_v5 }
  0xae   :  { %v144_v11 = vadd.f32 %v142_v8, %v132_v6  ;;  %v143_v12 = vadd.f32 %v141_v9, %v131_v7  ;;  %v154_v15 = vpop.permute.xlu1 %153  ;;  %v152_v17 = vpop.permute.xlu0 %151 }
  0xaf   :  { %v156_v13 = vsel %vm56_vm5, %v154_v15, 0.0  ;;  %v155_v14 = vsel %vm56_vm5, %v152_v17, 0.0 }
  0xb0   :  { %v150_v18 = vadd.f32 %v148_v3, %v144_v11  ;;  %v160_v19 = vmul.f32 %v158_v10, %v156_v13  ;;  %v149_v20 = vadd.f32 %v147_v0, %v143_v12  ;;  %v159_v21 = vmul.f32 %v158_v10, %v155_v14 }
  0xb2   :  { %v551_v22 = vadd.f32 %v160_v19, %v150_v18  ;;  %v553_v23 = vadd.f32 %v159_v21, %v149_v20 }
  0xb4   :  { %163 = vrot.lane.b32.xlu0 %v553_v23, %s422_s30  ;;  %165 = vrot.lane.b32.xlu1 %v551_v22, %s422_s30 }
  0xb8   :  { %167 = vrot.lane.b32.xlu0 %v553_v23, %s423_s14  ;;  %169 = vrot.lane.b32.xlu1 %v551_v22, %s423_s14 }
 0x126   :  { %v164_v24 = vpop.permute.xlu0 %163  ;;  %v166_v25 = vpop.permute.xlu1 %165 }
 0x12a   :  { %v168_v26 = vpop.permute.xlu0 %167  ;;  %v170_v27 = vpop.permute.xlu1 %169 }
 0x12b   :  { %v172_v28 = vsel %vm171_vm6, %v164_v24, %v168_v26  ;;  %v173_v29 = vsel %vm171_vm6, %v166_v25, %v170_v27  ;;  %v269_v25 = vmax.f32 %v553_v23, %v551_v22 }
 0x12c   :  { %v174_v30 = vmax.f32 %v553_v23, %v172_v28  ;;  %v175_v31 = vmax.f32 %v551_v22, %v173_v29 }
 0x12d   :  { %v270_v26 = vrot.slane %v269_v25, 4 }
 0x12e   :  { %176 = vrot.lane.b32.xlu0 %v174_v30, %s424_s15  ;;  %178 = vrot.lane.b32.xlu1 %v175_v31, %s424_s15 }
 0x12f   :  { %v271_v27 = vmax.f32 %v269_v25, %v270_v26 }
 0x131   :  { %v272_v28 = vrot.slane %v271_v27, 2 }
 0x132   :  { %180 = vrot.lane.b32.xlu0 %v174_v30, %s425_s16  ;;  %182 = vrot.lane.b32.xlu1 %v175_v31, %s425_s16 }
 0x133   :  { %v273_v29 = vmax.f32 %v271_v27, %v272_v28 }
 0x1a0   :  { %v177_v32 = vpop.permute.xlu0 %176  ;;  %v179_v33 = vpop.permute.xlu1 %178 }
 0x1a4   :  { %v181_v34 = vpop.permute.xlu0 %180  ;;  %v183_v35 = vpop.permute.xlu1 %182 }
 0x1a5   :  { %v185_v36 = vsel %vm184_vm7, %v177_v32, %v181_v34  ;;  %v186_v37 = vsel %vm184_vm7, %v179_v33, %v183_v35 }
 0x1a6   :  { %v187_v38 = vmax.f32 %v174_v30, %v185_v36  ;;  %v188_v39 = vmax.f32 %v175_v31, %v186_v37  ;;  %v274_v30 = vrot.slane %v273_v29, 1 }
 0x1a8   :  { %189 = vrot.lane.b32.xlu0 %v187_v38, %s426_s17  ;;  %191 = vrot.lane.b32.xlu1 %v188_v39, %s426_s17  ;;  %v275_v31 = vmax.f32 %v273_v29, %v274_v30 }
 0x1aa   :  { %v276_v32 = vsub.f32 %v553_v23, %v275_v31  ;;  %v277_v33 = vsub.f32 %v551_v22, %v275_v31 }
 0x1ac   :  { %193 = vrot.lane.b32.xlu0 %v187_v38, %s427_s18  ;;  %195 = vrot.lane.b32.xlu1 %v188_v39, %s427_s18  ;;  %v278_v34 = vmul.f32 1.442695, %v276_v32  ;;  %v280_v35 = vmul.f32 1.442695, %v277_v33 }
 0x21a   :  { %v190_v40 = vpop.permute.xlu0 %189  ;;  %v192_v41 = vpop.permute.xlu1 %191 }
 0x21e   :  { %v194_v42 = vpop.permute.xlu0 %193  ;;  %v196_v43 = vpop.permute.xlu1 %195 }
 0x21f   :  { %v198_v44 = vsel %vm197_vm8, %v190_v40, %v194_v42  ;;  %v199_v45 = vsel %vm197_vm8, %v192_v41, %v196_v43 }
 0x220   :  { %v200_v46 = vmax.f32 %v187_v38, %v198_v44  ;;  %v201_v47 = vmax.f32 %v188_v39, %v199_v45 }
 0x222   :  { %202 = vrot.lane.b32.xlu0 %v200_v46, %s420_s27  ;;  %204 = vrot.lane.b32.xlu1 %v201_v47, %s420_s27 }
 0x226   :  { %206 = vrot.lane.b32.xlu0 %v200_v46, %s428_s19  ;;  %208 = vrot.lane.b32.xlu1 %v201_v47, %s428_s19 }
 0x294   :  { %v203_v48 = vpop.permute.xlu0 %202  ;;  %v205_v49 = vpop.permute.xlu1 %204 }
 0x298   :  { %v207_v50 = vpop.permute.xlu0 %206  ;;  %v209_v51 = vpop.permute.xlu1 %208 }
 0x299   :  { %v211_v52 = vsel %vm210_vm9, %v203_v48, %v207_v50  ;;  %v212_v53 = vsel %vm210_vm9, %v205_v49, %v209_v51 }
 0x29a   :  { %v213_v54 = vmax.f32 %v200_v46, %v211_v52  ;;  %v214_v55 = vmax.f32 %v201_v47, %v212_v53 }
 0x29c   :  { %v215_v56 = vsub.f32 %v553_v23, %v213_v54  ;;  %v216_v57 = vsub.f32 %v551_v22, %v214_v55 }
 0x29e   :  { %v217_v58 = vmul.f32 1.442695, %v215_v56  ;;  %v219_v59 = vmul.f32 1.442695, %v216_v57 }
 0x2a0   :  { %343 = vpow2.f32 %v217_v58 }
 0x2a1   :  { %345 = vpow2.f32 %v219_v59  ;;  %v430_v59 = vmov 1.0  }
 0x2a2   :  { %347 = vpow2.f32 %v278_v34 }
 0x2a3   :  { %349 = vpow2.f32 %v280_v35 }
 0x2aa   :  { %v599_v60 = vpop.eup %343 }
 0x2ab   :  { %v601_v61 = vpop.eup %345  ;;  %221 = vrot.lane.b32.xlu0 %v599_v60, %s422_s30 }
 0x2ac   :  { %223 = vrot.lane.b32.xlu1 %v601_v61, %s422_s30  ;;  %v348_v36 = vpop.eup %347 }
 0x2ad   :  { %v350_v37 = vpop.eup %349  ;;  %v289_v53 = vmul.f32 %v348_v36, %v599_v60 }
 0x2ae   :  { %v282_v38 = vadd.f32 %v350_v37, %v348_v36  ;;  %v290_v55 = vmul.f32 %v350_v37, %v601_v61 }
 0x2af   :  { %225 = vrot.lane.b32.xlu0 %v599_v60, %s423_s14 }
 0x2b0   :  { %227 = vrot.lane.b32.xlu1 %v601_v61, %s423_s14  ;;  %v283_v39 = vrot.slane %v282_v38, 4 }
 0x2b2   :  { %v284_v40 = vadd.f32 %v283_v39, %v282_v38 }
 0x2b4   :  { %v285_v41 = vrot.slane %v284_v40, 2 }
 0x2b6   :  { %v286_v42 = vadd.f32 %v285_v41, %v284_v40 }
 0x2b8   :  { %v287_v45 = vrot.slane %v286_v42, 1 }
 0x2ba   :  { %v288_v48 = vadd.f32 %v287_v45, %v286_v42 }
 0x31d   :  { %v222_v62 = vpop.permute.xlu0 %221 }
 0x31e   :  { %v224_v63 = vpop.permute.xlu1 %223 }
 0x321   :  { %v226_v1 = vpop.permute.xlu0 %225 }
 0x322   :  { %v229_v2 = vsel %vm171_vm6, %v222_v62, %v226_v1  ;;  %v228_v3 = vpop.permute.xlu1 %227 }
 0x323   :  { %v231_v0 = vadd.f32 %v599_v60, %v229_v2  ;;  %v230_v4 = vsel %vm171_vm6, %v224_v63, %v228_v3 }
 0x324   :  { %v232_v5 = vadd.f32 %v601_v61, %v230_v4 }
 0x325   :  { %233 = vrot.lane.b32.xlu0 %v231_v0, %s424_s15 }
 0x326   :  { %235 = vrot.lane.b32.xlu1 %v232_v5, %s424_s15 }
 0x329   :  { %237 = vrot.lane.b32.xlu0 %v231_v0, %s425_s16 }
 0x32a   :  { %239 = vrot.lane.b32.xlu1 %v232_v5, %s425_s16 }
 0x397   :  { %v234_v6 = vpop.permute.xlu0 %233 }
 0x398   :  { %v236_v7 = vpop.permute.xlu1 %235 }
 0x39b   :  { %v238_v8 = vpop.permute.xlu0 %237 }
 0x39c   :  { %v241_v9 = vsel %vm184_vm7, %v234_v6, %v238_v8  ;;  %v240_v10 = vpop.permute.xlu1 %239 }
 0x39d   :  { %v243_v11 = vadd.f32 %v241_v9, %v231_v0  ;;  %v242_v12 = vsel %vm184_vm7, %v236_v7, %v240_v10 }
 0x39e   :  { %v244_v15 = vadd.f32 %v242_v12, %v232_v5 }
 0x39f   :  { %245 = vrot.lane.b32.xlu0 %v243_v11, %s426_s17 }
 0x3a0   :  { %247 = vrot.lane.b32.xlu1 %v244_v15, %s426_s17 }
 0x3a3   :  { %249 = vrot.lane.b32.xlu0 %v243_v11, %s427_s18 }
 0x3a4   :  { %251 = vrot.lane.b32.xlu1 %v244_v15, %s427_s18 }
 0x411   :  { %v246_v17 = vpop.permute.xlu0 %245 }
 0x412   :  { %v248_v13 = vpop.permute.xlu1 %247 }
 0x415   :  { %v250_v14 = vpop.permute.xlu0 %249 }
 0x416   :  { %v253_v18 = vsel %vm197_vm8, %v246_v17, %v250_v14  ;;  %v252_v19 = vpop.permute.xlu1 %251 }
 0x417   :  { %v255_v20 = vadd.f32 %v253_v18, %v243_v11  ;;  %v254_v21 = vsel %vm197_vm8, %v248_v13, %v252_v19 }
 0x418   :  { %v256_v24 = vadd.f32 %v254_v21, %v244_v15 }
 0x419   :  { %257 = vrot.lane.b32.xlu0 %v255_v20, %s420_s27 }
 0x41a   :  { %259 = vrot.lane.b32.xlu1 %v256_v24, %s420_s27 }
 0x41d   :  { %261 = vrot.lane.b32.xlu0 %v255_v20, %s428_s19 }
 0x41e   :  { %263 = vrot.lane.b32.xlu1 %v256_v24, %s428_s19 }
 0x48b   :  { %v258_v43 = vpop.permute.xlu0 %257 }
 0x48c   :  { %v260_v44 = vpop.permute.xlu1 %259 }
 0x48f   :  { %v262_v46 = vpop.permute.xlu0 %261 }
 0x490   :  { %v265_v23 = vsel %vm210_vm9, %v258_v43, %v262_v46  ;;  %v264_v47 = vpop.permute.xlu1 %263 }
 0x491   :  { %v267_v22 = vadd.f32 %v265_v23, %v255_v20  ;;  %v266_v49 = vsel %vm210_vm9, %v260_v44, %v264_v47 }
 0x492   :  { %v268_v50 = vadd.f32 %v266_v49, %v256_v24 }
 0x493   :  { %v291_v51 = vmul.f32 %v288_v48, %v267_v22 }
 0x494   :  { %v292_v52 = vmul.f32 %v288_v48, %v268_v50 }
 0x495   :  { %351 = vrcp.f32 %v291_v51 }
 0x496   :  { %353 = vrcp.f32 %v292_v52 }
 0x49f   :  { %v352_v54 = vpop.eup %351 }
 0x4a0   :  { %v354_v56 = vpop.eup %353  ;;  %v295_v57 = vmul.f32 %v352_v54, %v289_v53 }
 0x4a1   :  { %v296_v58 = vmul.f32 %v354_v56, %v290_v55 }
 0x4a2   :  { %vm297_vm10 = vcmp.gt.f32.partialorder %v295_v57, 0.005859375 }
 0x4a3   :  { %vm298_vm11 = vcmp.gt.f32.partialorder %v296_v58, 0.005859375  ;;  %v299_v16 = vsel %vm297_vm10, 0.0, %v430_v59 }
 0x4a4   :  { %v300_v62 = vsel %vm298_vm11, 0.0, %v430_v59  ;;  %301 = vst [vmem:[#allocation8] sm:$0xff] %v299_v16 }
 0x4a5   :  { %302 = vst [vmem:[#allocation8 + $0x8] sm:$0xff] %v300_v62 }
 0x4a6   :  { %400 = shalt.err (!%p397_p3)
}
 0x4a7   :  { %s401_s24 = scalar_lea.hbm %s665_s3, 256 }
 0x4a8   :  { %p402_p4 = scmp.ne.s32.totalorder %s665_s3, %s401_s24  ;;  %p405_p5 = scmp.lt.u32.totalorder %s401_s24, %s665_s3 }
 0x4aa   :  { %p407_p6 = pnand %p405_p5, %p402_p4 }
 0x4ac   :  { %410 = shalt.err (!%p407_p6)
}
 0x4ad   :  { %314 = dma.vmem_to_hbm [thread:$0]  %s309_s21, 256, %s665_s3, [#allocation5], %s419_s26, %s419_s26, %s420_s27  }
 0x4ae   :  { %415 = dma.done.wait [#allocation5], 256  }
 0x4af   :  { %416 = vsyncadd [#allocation5], 4294967040 }
 0x4b0   :  { %318 = vsyncpa [#allocation4], 1 }
 0x4b1   :  { %319 = vsyncpa [#allocation5], 1 }
 0x4b2   :  { %320 = vsyncpa [#allocation6], 1 }

</bundles_post_ra>
